<compile_context>
chip_gen: v7x
topology: tpu7x:2x2x1
jax: 0.10.0
libtpu: 0.0.40
codegen_flags: <defaults>
</compile_context>

<pallas_src>
import jax
import jax.numpy as jnp
from jax.experimental import pallas as pl
from jax.experimental.pallas import tpu as pltpu

PAD_INDEX = 0
LANE = 128  # pad the tiny n_labels output up to a full lane group for a dense store


def _gelu(x):
    # tanh-approximate GELU (lowers to the EUP tanh slot on TPU; matches
    # jax.nn.gelu(approximate=True)).
    c = 0.7978845608028654  # sqrt(2/pi)
    return 0.5 * x * (1.0 + jnp.tanh(c * (x + 0.044715 * x * x * x)))


# ---------------------------------------------------------------------------
# Single fused kernel: embedding-LUT + one-hot gather + FF layers + masked
# average pooling + output head, for premise AND hypothesis together.
# Row layout: rows [0, B*S) are the flattened premise tokens, rows [B*S, 2*B*S)
# are the flattened hypothesis tokens; group g = S consecutive rows = one sequence.
# ---------------------------------------------------------------------------
def fused_forward_kernel(tok_ref, cnt_p_ref, cnt_h_ref, emb_ref, w_ep_ref, b_ep_ref,
                         w_ff_ref, b_ff_ref, w_out_ref, b_out_ref, o_ref):
    R = tok_ref.shape[0]            # 2 * B * S rows
    V = emb_ref.shape[0]            # vocab
    B = o_ref.shape[0]              # batch
    S = R // (2 * B)                # sequence length
    num_layers = w_ff_ref.shape[0]

    # --- embedding (+ Dropout=identity + Linear) + GELU folded into a LUT (V, H) ---
    lut = _gelu(jnp.dot(emb_ref[...], w_ep_ref[...],
                        preferred_element_type=jnp.float32) + b_ep_ref[...])

    # --- gather LUT rows with a one-hot matmul on the MXU (no gather op) ---
    ids = tok_ref[...]                                                          # (R, 1) int32
    onehot = (ids == jax.lax.broadcasted_iota(jnp.int32, (R, V), 1)).astype(jnp.float32)
    x = jnp.dot(onehot, lut, preferred_element_type=jnp.float32)                # (R, H)

    # --- FF layers: gelu(x @ W + b); shared weights for premise & hypothesis rows ---
    for l in range(num_layers):
        x = _gelu(jnp.dot(x, w_ff_ref[l], preferred_element_type=jnp.float32) + b_ff_ref[l])

    # --- masked AVG pooling via 0/1 pooling matrices on the MXU ---
    # premise batch g  -> rows [g*S, (g+1)*S)
    # hypothesis batch g -> rows [(B+g)*S, (B+g+1)*S)
    g_iota = jax.lax.broadcasted_iota(jnp.int32, (B, R), 0)
    r_iota = jax.lax.broadcasted_iota(jnp.int32, (B, R), 1)
    lo_p = g_iota * S
    lo_h = lo_p + B * S
    pool_p = ((r_iota >= lo_p) & (r_iota < lo_p + S)).astype(jnp.float32)        # (B, R)
    pool_h = ((r_iota >= lo_h) & (r_iota < lo_h + S)).astype(jnp.float32)        # (B, R)

    # Numerator sums ALL positions (including pads), denominator counts non-pad
    # tokens — exactly the reference AVGPooling semantics.
    # TODO(synk): no guard for an all-PAD sequence (cnt == 0); mirrors the reference.
    pooled_p = jnp.dot(pool_p, x, preferred_element_type=jnp.float32) / cnt_p_ref[...]  # (B, H)
    pooled_h = jnp.dot(pool_h, x, preferred_element_type=jnp.float32) / cnt_h_ref[...]  # (B, H)

    # --- output head: one lane-dense (B, 4H) = (2, 128) tile, single K=128 matmul ---
    combined = jnp.concatenate(
        [pooled_p, pooled_h, jnp.abs(pooled_p - pooled_h), pooled_p * pooled_h], axis=1)
    o_ref[...] = jnp.dot(combined, w_out_ref[...],
                         preferred_element_type=jnp.float32) + b_out_ref[...]    # (B, LANE)


# ---------------------------------------------------------------------------
# Wrapper: small scalar/packing glue + one pallas_call.
# ---------------------------------------------------------------------------
def model_forward(params, premise, hypothesis):
    B, S = premise.shape
    H = params["w_emb_proj"].shape[1]
    L = params["w_out"].shape[1]

    # premise rows first, hypothesis rows second; one column so ids map to sublanes
    tokens = jnp.concatenate([premise, hypothesis], axis=0).reshape(2 * B * S, 1).astype(jnp.int32)

    # non-pad counts for the masked-average denominator (tiny scalar glue)
    cnt_p = (premise != PAD_INDEX).sum(axis=1, keepdims=True).astype(jnp.float32)
    cnt_h = (hypothesis != PAD_INDEX).sum(axis=1, keepdims=True).astype(jnp.float32)

    # stack the FF-layer weights so the kernel has a fixed argument list
    w_ff = jnp.stack([w for (w, _) in params["ff_layers"]])                 # (NL, H, H)
    b_ff = jnp.stack([b.reshape(1, H) for (_, b) in params["ff_layers"]])   # (NL, 1, H)

    # zero-pad the head to 128 output lanes -> unmasked, lane-dense final store
    w_out_p = jnp.zeros((4 * H, LANE), jnp.float32).at[:, :L].set(params["w_out"])
    b_out_p = jnp.zeros((1, LANE), jnp.float32).at[:, :L].set(params["b_out"])

    inputs = (tokens, cnt_p, cnt_h,
              params["emb_table"], params["w_emb_proj"], params["b_emb_proj"].reshape(1, H),
              w_ff, b_ff, w_out_p, b_out_p)

    out = pl.pallas_call(
        fused_forward_kernel,
        out_shape=jax.ShapeDtypeStruct((B, LANE), jnp.float32),
        # no grid: every operand is a single whole-array VMEM-resident block
        # (all weights + activations total well under 1 MiB on v5e/v6e/v7x)
        in_specs=[pl.BlockSpec(memory_space=pltpu.MemorySpace.VMEM)] * len(inputs),
        out_specs=pl.BlockSpec(memory_space=pltpu.MemorySpace.VMEM),
    )(*inputs)

    return out[:, :L]


# ---------------------------------------------------------------------------
# Pure-JAX reference (same tanh-GELU so the check compares identical math).
# ---------------------------------------------------------------------------
def model_forward_ref(params, premise, hypothesis):
    mask_p = premise == PAD_INDEX
    mask_h = hypothesis == PAD_INDEX

    def embed(tok):
        e = params["emb_table"][tok]
        return _gelu(e @ params["w_emb_proj"] + params["b_emb_proj"])

    out_p, out_h = embed(premise), embed(hypothesis)
    for (w, b) in params["ff_layers"]:
        out_p = _gelu(out_p @ w + b)
        out_h = _gelu(out_h @ w + b)

    pooled_p = out_p.sum(axis=1) / (~mask_p).sum(axis=1, keepdims=True)
    pooled_h = out_h.sum(axis=1) / (~mask_h).sum(axis=1, keepdims=True)
    combined = jnp.concatenate(
        [pooled_p, pooled_h, jnp.abs(pooled_p - pooled_h), pooled_p * pooled_h], axis=1)
    return combined @ params["w_out"] + params["b_out"]


# ---------------------------------------------------------------------------
# Deterministic parameter init (PyTorch-style uniform(-1/sqrt(fan_in), ...)).
# ---------------------------------------------------------------------------
def init_params(key, vocab, embed_dim, hidden, num_layers, n_labels):
    keys = iter(jax.random.split(key, 1 + 2 + 2 * num_layers + 2))

    def lin(fan_in, fan_out):
        bound = 1.0 / (fan_in ** 0.5)
        kw, kb = next(keys), next(keys)
        w = jax.random.uniform(kw, (fan_in, fan_out), jnp.float32, -bound, bound)
        b = jax.random.uniform(kb, (fan_out,), jnp.float32, -bound, bound)
        return w, b

    emb_table = jax.random.normal(next(keys), (vocab, embed_dim), jnp.float32)
    emb_table = emb_table.at[PAD_INDEX].set(0.0)   # typical pretrained [PAD] row
    w_ep, b_ep = lin(embed_dim, hidden)
    ff_layers = [lin(hidden, hidden) for _ in range(num_layers)]
    w_out, b_out = lin(4 * hidden, n_labels)
    return {
        "emb_table": emb_table,
        "w_emb_proj": w_ep, "b_emb_proj": b_ep,
        "ff_layers": ff_layers,
        "w_out": w_out, "b_out": b_out,
    }


if __name__ == "__main__":
    B, S = 2, 8
    VOCAB, EMBED, HIDDEN, N_LAYERS, N_LABELS = 32, 16, 32, 2, 3

    key = jax.random.PRNGKey(0)
    k_par, k_p, k_h = jax.random.split(key, 3)
    params = init_params(k_par, VOCAB, EMBED, HIDDEN, N_LAYERS, N_LABELS)

    # token ids in [1, VOCAB), with trailing PAD (=0) positions
    premise = jax.random.randint(k_p, (B, S), 1, VOCAB, dtype=jnp.int32)
    hypothesis = jax.random.randint(k_h, (B, S), 1, VOCAB, dtype=jnp.int32)
    premise = premise.at[0, 6:].set(PAD_INDEX).at[1, 5:].set(PAD_INDEX)
    hypothesis = hypothesis.at[0, 7:].set(PAD_INDEX).at[1, 4:].set(PAD_INDEX)

    fwd = jax.jit(model_forward)
    logits = jax.block_until_ready(fwd(params, premise, hypothesis))

    ref = model_forward_ref(params, premise, hypothesis)
    assert logits.shape == (B, N_LABELS)
    assert jnp.allclose(logits, ref, atol=5e-3, rtol=5e-3), (logits, ref)

    print("KERNEL_OK")
</pallas_src>

<mosaic_0001>
module attributes {stable_mosaic.version = 11 : i64} {
  func.func @fused_forward_kernel(%arg0: memref<32x1xi32, #tpu.memory_space<vmem>>, %arg1: memref<2x1xf32, #tpu.memory_space<vmem>>, %arg2: memref<2x1xf32, #tpu.memory_space<vmem>>, %arg3: memref<32x16xf32, #tpu.memory_space<vmem>>, %arg4: memref<16x32xf32, #tpu.memory_space<vmem>>, %arg5: memref<1x32xf32, #tpu.memory_space<vmem>>, %arg6: memref<2x32x32xf32, #tpu.memory_space<vmem>>, %arg7: memref<2x1x32xf32, #tpu.memory_space<vmem>>, %arg8: memref<128x128xf32, #tpu.memory_space<vmem>>, %arg9: memref<1x128xf32, #tpu.memory_space<vmem>>, %arg10: memref<2x128xf32, #tpu.memory_space<vmem>>) attributes {dimension_semantics = [], scalar_prefetch = 0 : i64, scratch_operands = 0 : i64, tpu.core_type = #tpu.core_type<tc>} {
    %c0 = arith.constant 0 : index
    %c0_0 = arith.constant 0 : index
    %0 = vector.load %arg3[%c0, %c0_0] : memref<32x16xf32, #tpu.memory_space<vmem>>, vector<32x16xf32>
    %c0_1 = arith.constant 0 : index
    %c0_2 = arith.constant 0 : index
    %1 = vector.load %arg4[%c0_1, %c0_2] : memref<16x32xf32, #tpu.memory_space<vmem>>, vector<16x32xf32>
    %cst = arith.constant dense<0.000000e+00> : vector<32x32xf32>
    %2 = tpu.matmul %0, %1, %cst {dimension_numbers = #tpu.dot_dimension_numbers<[1], [0], [0], [1], [0, 0, 1, 1], [], []>} : vector<32x16xf32>, vector<16x32xf32>, vector<32x32xf32> -> vector<32x32xf32>
    %c0_3 = arith.constant 0 : index
    %c0_4 = arith.constant 0 : index
    %3 = vector.load %arg5[%c0_3, %c0_4] : memref<1x32xf32, #tpu.memory_space<vmem>>, vector<1x32xf32>
    %4 = vector.broadcast %3 : vector<1x32xf32> to vector<32x32xf32>
    %5 = arith.addf %2, %4 : vector<32x32xf32>
    %cst_5 = arith.constant 5.000000e-01 : f32
    %6 = vector.broadcast %cst_5 : f32 to vector<32x32xf32>
    %7 = arith.mulf %6, %5 : vector<32x32xf32>
    %cst_6 = arith.constant 4.471500e-02 : f32
    %8 = vector.broadcast %cst_6 : f32 to vector<32x32xf32>
    %9 = arith.mulf %8, %5 : vector<32x32xf32>
    %10 = arith.mulf %9, %5 : vector<32x32xf32>
    %11 = arith.mulf %10, %5 : vector<32x32xf32>
    %12 = arith.addf %5, %11 : vector<32x32xf32>
    %cst_7 = arith.constant 0.797884583 : f32
    %13 = vector.broadcast %cst_7 : f32 to vector<32x32xf32>
    %14 = arith.mulf %13, %12 : vector<32x32xf32>
    %15 = math.tanh %14 : vector<32x32xf32>
    %cst_8 = arith.constant 1.000000e+00 : f32
    %16 = vector.broadcast %cst_8 : f32 to vector<32x32xf32>
    %17 = arith.addf %16, %15 : vector<32x32xf32>
    %18 = arith.mulf %7, %17 : vector<32x32xf32>
    %c0_9 = arith.constant 0 : index
    %c0_10 = arith.constant 0 : index
    %19 = vector.load %arg0[%c0_9, %c0_10] : memref<32x1xi32, #tpu.memory_space<vmem>>, vector<32x1xi32>
    %20 = tpu.iota {dimensions = array<i32: 1>} : vector<32x32xi32>
    %21 = vector.broadcast %19 : vector<32x1xi32> to vector<32x32xi32>
    %22 = arith.cmpi eq, %21, %20 : vector<32x32xi32>
    %23 = arith.extui %22 : vector<32x32xi1> to vector<32x32xi32>
    %24 = arith.sitofp %23 : vector<32x32xi32> to vector<32x32xf32>
    %cst_11 = arith.constant dense<0.000000e+00> : vector<32x32xf32>
    %25 = tpu.matmul %24, %18, %cst_11 {dimension_numbers = #tpu.dot_dimension_numbers<[1], [0], [0], [1], [0, 0, 1, 1], [], []>} : vector<32x32xf32>, vector<32x32xf32>, vector<32x32xf32> -> vector<32x32xf32>
    %c0_12 = arith.constant 0 : index
    %c0_13 = arith.constant 0 : index
    %c0_14 = arith.constant 0 : index
    %26 = vector.load %arg6[%c0_12, %c0_13, %c0_14] : memref<2x32x32xf32, #tpu.memory_space<vmem>>, vector<1x32x32xf32>
    %27 = vector.shape_cast %26 : vector<1x32x32xf32> to vector<32x32xf32>
    %cst_15 = arith.constant dense<0.000000e+00> : vector<32x32xf32>
    %28 = tpu.matmul %25, %27, %cst_15 {dimension_numbers = #tpu.dot_dimension_numbers<[1], [0], [0], [1], [0, 0, 1, 1], [], []>} : vector<32x32xf32>, vector<32x32xf32>, vector<32x32xf32> -> vector<32x32xf32>
    %c0_16 = arith.constant 0 : index
    %c0_17 = arith.constant 0 : index
    %c0_18 = arith.constant 0 : index
    %29 = vector.load %arg7[%c0_16, %c0_17, %c0_18] : memref<2x1x32xf32, #tpu.memory_space<vmem>>, vector<1x1x32xf32>
    %30 = vector.shape_cast %29 : vector<1x1x32xf32> to vector<1x32xf32>
    %31 = vector.broadcast %30 : vector<1x32xf32> to vector<32x32xf32>
    %32 = arith.addf %28, %31 : vector<32x32xf32>
    %cst_19 = arith.constant 5.000000e-01 : f32
    %33 = vector.broadcast %cst_19 : f32 to vector<32x32xf32>
    %34 = arith.mulf %33, %32 : vector<32x32xf32>
    %cst_20 = arith.constant 4.471500e-02 : f32
    %35 = vector.broadcast %cst_20 : f32 to vector<32x32xf32>
    %36 = arith.mulf %35, %32 : vector<32x32xf32>
    %37 = arith.mulf %36, %32 : vector<32x32xf32>
    %38 = arith.mulf %37, %32 : vector<32x32xf32>
    %39 = arith.addf %32, %38 : vector<32x32xf32>
    %cst_21 = arith.constant 0.797884583 : f32
    %40 = vector.broadcast %cst_21 : f32 to vector<32x32xf32>
    %41 = arith.mulf %40, %39 : vector<32x32xf32>
    %42 = math.tanh %41 : vector<32x32xf32>
    %cst_22 = arith.constant 1.000000e+00 : f32
    %43 = vector.broadcast %cst_22 : f32 to vector<32x32xf32>
    %44 = arith.addf %43, %42 : vector<32x32xf32>
    %45 = arith.mulf %34, %44 : vector<32x32xf32>
    %c1 = arith.constant 1 : index
    %c0_23 = arith.constant 0 : index
    %c0_24 = arith.constant 0 : index
    %46 = vector.load %arg6[%c1, %c0_23, %c0_24] : memref<2x32x32xf32, #tpu.memory_space<vmem>>, vector<1x32x32xf32>
    %47 = vector.shape_cast %46 : vector<1x32x32xf32> to vector<32x32xf32>
    %cst_25 = arith.constant dense<0.000000e+00> : vector<32x32xf32>
    %48 = tpu.matmul %45, %47, %cst_25 {dimension_numbers = #tpu.dot_dimension_numbers<[1], [0], [0], [1], [0, 0, 1, 1], [], []>} : vector<32x32xf32>, vector<32x32xf32>, vector<32x32xf32> -> vector<32x32xf32>
    %c1_26 = arith.constant 1 : index
    %c0_27 = arith.constant 0 : index
    %c0_28 = arith.constant 0 : index
    %49 = vector.load %arg7[%c1_26, %c0_27, %c0_28] : memref<2x1x32xf32, #tpu.memory_space<vmem>>, vector<1x1x32xf32>
    %50 = vector.shape_cast %49 : vector<1x1x32xf32> to vector<1x32xf32>
    %51 = vector.broadcast %50 : vector<1x32xf32> to vector<32x32xf32>
    %52 = arith.addf %48, %51 : vector<32x32xf32>
    %cst_29 = arith.constant 5.000000e-01 : f32
    %53 = vector.broadcast %cst_29 : f32 to vector<32x32xf32>
    %54 = arith.mulf %53, %52 : vector<32x32xf32>
    %cst_30 = arith.constant 4.471500e-02 : f32
    %55 = vector.broadcast %cst_30 : f32 to vector<32x32xf32>
    %56 = arith.mulf %55, %52 : vector<32x32xf32>
    %57 = arith.mulf %56, %52 : vector<32x32xf32>
    %58 = arith.mulf %57, %52 : vector<32x32xf32>
    %59 = arith.addf %52, %58 : vector<32x32xf32>
    %cst_31 = arith.constant 0.797884583 : f32
    %60 = vector.broadcast %cst_31 : f32 to vector<32x32xf32>
    %61 = arith.mulf %60, %59 : vector<32x32xf32>
    %62 = math.tanh %61 : vector<32x32xf32>
    %cst_32 = arith.constant 1.000000e+00 : f32
    %63 = vector.broadcast %cst_32 : f32 to vector<32x32xf32>
    %64 = arith.addf %63, %62 : vector<32x32xf32>
    %65 = arith.mulf %54, %64 : vector<32x32xf32>
    %66 = tpu.iota {dimensions = array<i32: 0>} : vector<2x32xi32>
    %67 = tpu.iota {dimensions = array<i32: 1>} : vector<2x32xi32>
    %c8_i32 = arith.constant 8 : i32
    %68 = vector.broadcast %c8_i32 : i32 to vector<2x32xi32>
    %69 = arith.muli %66, %68 : vector<2x32xi32>
    %c16_i32 = arith.constant 16 : i32
    %70 = vector.broadcast %c16_i32 : i32 to vector<2x32xi32>
    %71 = arith.addi %69, %70 : vector<2x32xi32>
    %72 = arith.cmpi sge, %67, %69 : vector<2x32xi32>
    %c8_i32_33 = arith.constant 8 : i32
    %73 = vector.broadcast %c8_i32_33 : i32 to vector<2x32xi32>
    %74 = arith.addi %69, %73 : vector<2x32xi32>
    %75 = arith.cmpi slt, %67, %74 : vector<2x32xi32>
    %76 = arith.andi %72, %75 : vector<2x32xi1>
    %77 = arith.extui %76 : vector<2x32xi1> to vector<2x32xi32>
    %78 = arith.sitofp %77 : vector<2x32xi32> to vector<2x32xf32>
    %79 = arith.cmpi sge, %67, %71 : vector<2x32xi32>
    %c8_i32_34 = arith.constant 8 : i32
    %80 = vector.broadcast %c8_i32_34 : i32 to vector<2x32xi32>
    %81 = arith.addi %71, %80 : vector<2x32xi32>
    %82 = arith.cmpi slt, %67, %81 : vector<2x32xi32>
    %83 = arith.andi %79, %82 : vector<2x32xi1>
    %84 = arith.extui %83 : vector<2x32xi1> to vector<2x32xi32>
    %85 = arith.sitofp %84 : vector<2x32xi32> to vector<2x32xf32>
    %cst_35 = arith.constant dense<0.000000e+00> : vector<2x32xf32>
    %86 = tpu.matmul %78, %65, %cst_35 {dimension_numbers = #tpu.dot_dimension_numbers<[1], [0], [0], [1], [0, 0, 1, 1], [], []>} : vector<2x32xf32>, vector<32x32xf32>, vector<2x32xf32> -> vector<2x32xf32>
    %c0_36 = arith.constant 0 : index
    %c0_37 = arith.constant 0 : index
    %87 = vector.load %arg1[%c0_36, %c0_37] : memref<2x1xf32, #tpu.memory_space<vmem>>, vector<2x1xf32>
    %88 = vector.broadcast %87 : vector<2x1xf32> to vector<2x32xf32>
    %89 = arith.divf %86, %88 : vector<2x32xf32>
    %cst_38 = arith.constant dense<0.000000e+00> : vector<2x32xf32>
    %90 = tpu.matmul %85, %65, %cst_38 {dimension_numbers = #tpu.dot_dimension_numbers<[1], [0], [0], [1], [0, 0, 1, 1], [], []>} : vector<2x32xf32>, vector<32x32xf32>, vector<2x32xf32> -> vector<2x32xf32>
    %c0_39 = arith.constant 0 : index
    %c0_40 = arith.constant 0 : index
    %91 = vector.load %arg2[%c0_39, %c0_40] : memref<2x1xf32, #tpu.memory_space<vmem>>, vector<2x1xf32>
    %92 = vector.broadcast %91 : vector<2x1xf32> to vector<2x32xf32>
    %93 = arith.divf %90, %92 : vector<2x32xf32>
    %94 = arith.subf %89, %93 : vector<2x32xf32>
    %95 = math.absf %94 : vector<2x32xf32>
    %96 = arith.mulf %89, %93 : vector<2x32xf32>
    %97 = tpu.concatenate %89, %93, %95, %96 in 1 : vector<2x32xf32>, vector<2x32xf32>, vector<2x32xf32>, vector<2x32xf32> -> vector<2x128xf32>
    %c0_41 = arith.constant 0 : index
    %c0_42 = arith.constant 0 : index
    %98 = vector.load %arg8[%c0_41, %c0_42] : memref<128x128xf32, #tpu.memory_space<vmem>>, vector<128x128xf32>
    %cst_43 = arith.constant dense<0.000000e+00> : vector<2x128xf32>
    %99 = tpu.matmul %97, %98, %cst_43 {dimension_numbers = #tpu.dot_dimension_numbers<[1], [0], [0], [1], [0, 0, 1, 1], [], []>} : vector<2x128xf32>, vector<128x128xf32>, vector<2x128xf32> -> vector<2x128xf32>
    %c0_44 = arith.constant 0 : index
    %c0_45 = arith.constant 0 : index
    %100 = vector.load %arg9[%c0_44, %c0_45] : memref<1x128xf32, #tpu.memory_space<vmem>>, vector<1x128xf32>
    %101 = vector.broadcast %100 : vector<1x128xf32> to vector<2x128xf32>
    %102 = arith.addf %99, %101 : vector<2x128xf32>
    %c0_46 = arith.constant 0 : index
    %c0_47 = arith.constant 0 : index
    %103 = vector.load %arg10[%c0_46, %c0_47] : memref<2x128xf32, #tpu.memory_space<vmem>>, vector<2x128xf32>
    tpu.vector_store %arg10[%c0_46, %c0_47], %102 {strides = array<i32>} : memref<2x128xf32, #tpu.memory_space<vmem>>, vector<2x128xf32>,
    return
  }
}

</mosaic_0001>

<bundles_post_ra>
// kernel: model_forward.1
= control target key start
LH: loop header
LB: loop body
LE: loop exit
PB: predicated region body
PF: predicated region fallthrough
CT: control target
= control target key end

     0   :  { %vm49_vm0 = vcmask 130048   ;;  %v1232_v4 = vmov 0   ;;  %s1482_s0 = inlined_call_operand.vmem [shape: s32[32,1], index: 0, kind: input, shape index: {}]   ;;  %s1483_s1 = inlined_call_operand.vmem [shape: f32[2,1], index: 1, kind: input, shape index: {}]   ;;  %s1484_s2 = inlined_call_operand.vmem [shape: f32[2,1], index: 2, kind: input, shape index: {}]   ;;  %s1485_s3 = inlined_call_operand.vmem [shape: f32[32,16], index: 3, kind: input, shape index: {}]   ;;  %s1486_s4 = inlined_call_operand.vmem [shape: f32[16,32], index: 4, kind: input, shape index: {}]   ;;  %s1487_s5 = inlined_call_operand.vmem [shape: f32[1,32], index: 5, kind: input, shape index: {}]   ;;  %s1488_s6 = inlined_call_operand.vmem [shape: f32[2,32,32], index: 6, kind: input, shape index: {}]   ;;  %s1489_s7 = inlined_call_operand.vmem [shape: f32[2,1,32], index: 7, kind: input, shape index: {}]   ;;  %s1490_s8 = inlined_call_operand.vmem [shape: f32[128,128], index: 8, kind: input, shape index: {}]   ;;  %s1491_s9 = inlined_call_operand.vmem [shape: f32[1,128], index: 9, kind: input, shape index: {}]   ;;  %s1492_s10 = inlined_call_operand.hbm [shape: f32[2,128], index: 10, kind: output, shape index: {}]  }
   0x1   :  { %v40_v0 = vld [vmem:[%s1486_s4] sm:$0xff]  ;;  %v41_v1 = vld [vmem:[%s1486_s4 + $0x8] sm:$0xff]  ;;  %1178 = vset.pattern.permute.xlu0 %v1232_v4  ;;  %1179 = vset.pattern.permute.xlu1 %v1232_v4  ;;  %v185_v6 = vld [vmem:[%s1482_s0 + $0x10] sm:$0xff] }
   0x2   :  { %v36_v2 = vld [vmem:[%s1485_s3] sm:$0xff]  ;;  %v1106_v3 = vpack.c.bf16 %v41_v1, %v40_v0  ;;  %v37_v7 = vld [vmem:[%s1485_s3 + $0x8] sm:$0xff]  ;;  %196 = vperm.xlu1 %1179, %v185_v6  }
   0x3   :  { %1001 = vmatprep.mubr.msk.f32.mxu1 %vm49_vm0, %v36_v2  ;;  %v183_v5 = vld [vmem:[%s1482_s0] sm:$0xff]  ;;  %v184_v8 = vld [vmem:[%s1482_s0 + $0x8] sm:$0xff] }
   0x4   :  { %1107 = vmatprep.subr.bf16.mxu1 %v1106_v3  ;;  %190 = vperm.xlu0 %1178, %v183_v5  }
   0x5   :  { %1109 = vmatpush3.bf16.msra.mxu1 %v1106_v3 }
   0x6   :  { %15 = vsyncpa [#allocation3], 0  ;;  %v38_v9 = vld [vmem:[%s1485_s3 + $0x10] sm:$0xff]  ;;  %v186_v10 = vld [vmem:[%s1482_s0 + $0x18] sm:$0xff]  ;;  %v187_v14 = vlaneseq  ;;  %vm213_vm1 = vcmask 261120   ;;  %v1233_v17 = vmov 0.0  }
   0x7   :  { %v39_v11 = vld [vmem:[%s1485_s3 + $0x18] sm:$0xff]  ;;  %199 = vperm.xlu1 %1179, %v186_v10   ;;  %v690_v12 = vld [vmem:[%s1483_s1] sm:$0x3]  ;;  %v312_v1 = vld [vmem:[%s1488_s6 + $0x8] sm:$0xff]  ;;  %vm1235_vm6 = vmmov 0   ;;  %s1236_s14 = smov 32  }
   0x8   :  { %1002 = vmatmul.mubr.msk.f32.vlgmr.msra.gmra.mrb[0].mxu1 %vm49_vm0, %v37_v7  ;;  %193 = vperm.xlu0 %1178, %v184_v8   ;;  %v771_v13 = vld [vmem:[%s1484_s2] sm:$0x3]  ;;  %v1336_v15 = vand.u32 127, %v187_v14  ;;  %v313_v7 = vld [vmem:[%s1488_s6 + $0x10] sm:$0xff]  ;;  %v314_v8 = vld [vmem:[%s1488_s6 + $0x18] sm:$0xff]  ;;  %s1237_s15 = smov 96  }
   0x9   :  { %1004 = vmatprep.mubr.msk.f32.mxu1 %vm49_vm0, %v38_v9  ;;  %v907_v19 = vld [vmem:[%s1487_s5] ss:$0 sm:$0xff]  ;;  %v1122_v10 = vpack.c.bf16 %v314_v8, %v313_v7  ;;  %v1234_v8 = vmov 0.0|0.0   ;;  %1057 = vmatprep.mubr.msk.f32.mxu0 %vm1235_vm6, %v1233_v17  ;;  %s1238_s0 = smov 64   ;;  %vm795_vm13 = vcmask 523264   ;;  %vm797_vm14 = vcmask 785408  }
   0xa   :  { %v311_v0 = vld [vmem:[%s1488_s6] sm:$0xff]  ;;  %1134 = vmatprep.subr.bf16.mxu0 %v1234_v8  ;;  %s1239_s2 = smov [#allocation2]  }
   0xb   :  { %774 = vperm.xlu1 %1179, %v771_v13   ;;  %v1118_v5 = vpack.c.bf16 %v312_v1, %v311_v0  ;;  %s899_s3 = sshll.u32 %s1239_s2, 4  ;;  %s900_s3 = int_to_ptr.vmem [resolvable:$true] %s899_s3 }
   0xc   :  { %1005 = vmatmul.mubr.msk.f32.gmra.mrb[2].mxu1 %vm49_vm0, %v39_v11  ;;  %693 = vperm.xlu0 %1178, %v690_v12   ;;  %s1208_s5 = scalar_lea.vmem %s900_s3, 32  ;;  %p1213_p1 = scmp.lt.s32.totalorder %s900_s3, %s900_s3 }
   0xd   :  { %p1209_p0 = scmp.ne.s32.totalorder %s900_s3, %s1208_s5  ;;  %p1214_p2 = scmp.lt.s32.totalorder %s1208_s5, %s1208_s5 }
   0xf   :  { %p1215_p3 = por %p1214_p2, %p1213_p1 }
  0x11   :  { %p1216_p4 = pnand %p1215_p3, %p1209_p0 }
  0x81   :  { %v197_v3 = vpop.permute.xlu1 %196 }
  0x82   :  { %vm203_vm3 = vcmp.eq.s32.totalorder %v197_v3, %v1336_v15 }
  0x83   :  { %v191_v16 = vpop.permute.xlu0 %190  ;;  %v914_v9 = vsel %vm203_vm3, 1.0, %v1233_v17 }
  0x84   :  { %vm201_vm2 = vcmp.eq.s32.totalorder %v191_v16, %v1336_v15 }
  0x85   :  { %v912_v18 = vsel %vm201_vm2, 1.0, %v1233_v17 }
  0x86   :  { %1015 = vmatprep.mubr.msk.f32.mxu1 %vm213_vm1, %v912_v18  ;;  %v200_v12 = vpop.permute.xlu1 %199 }
  0x87   :  { %v194_v6 = vpop.permute.xlu0 %193  ;;  %vm204_vm5 = vcmp.eq.s32.totalorder %v200_v12, %v1336_v15 }
  0x88   :  { %vm202_vm4 = vcmp.eq.s32.totalorder %v194_v6, %v1336_v15  ;;  %v915_v13 = vsel %vm204_vm5, 1.0, %v1233_v17 }
  0x89   :  { %v913_v11 = vsel %vm202_vm4, 1.0, %v1233_v17 }
  0xdb   :  { %v1003_v20 = vpop.f32.mrb[0].mxu1 }
  0xdc   :  { %v134_v21 = vadd.f32 %v1003_v20, %v907_v19  ;;  %v128_v22 = vpop.f32.mrb[1].mxu1 }
  0xdd   :  { %v129_v23 = vadd.f32 %v907_v19, %v128_v22  ;;  %v926_v22 = vld [vmem:[%s1488_s6 + $0x28] sm:$0xff] }
  0xde   :  { %v152_v24 = vmul.f32 0.044715, %v134_v21  ;;  %v148_v50 = vmul.f32 0.5, %v134_v21 }
  0xdf   :  { %v151_v25 = vmul.f32 0.044715, %v129_v23  ;;  %v1006_v26 = vpop.f32.mrb[2].mxu1  ;;  %v147_v52 = vmul.f32 0.5, %v129_v23 }
  0xe0   :  { %v156_v27 = vmul.f32 %v152_v24, %v134_v21  ;;  %v144_v28 = vadd.f32 %v1006_v26, %v907_v19  ;;  %v138_v29 = vpop.f32.mrb[3].mxu1  ;;  %v927_v24 = vld [vmem:[%s1488_s6 + $0x30] sm:$0xff] }
  0xe1   :  { %v155_v30 = vmul.f32 %v151_v25, %v129_v23  ;;  %v139_v31 = vadd.f32 %v907_v19, %v138_v29  ;;  %v928_v25 = vld [vmem:[%s1488_s6 + $0x38] sm:$0xff] }
  0xe2   :  { %v160_v32 = vmul.f32 %v156_v27, %v134_v21  ;;  %v154_v33 = vmul.f32 0.044715, %v144_v28  ;;  %v150_v58 = vmul.f32 0.5, %v144_v28  ;;  %v1130_v26 = vpack.c.bf16 %v928_v25, %v927_v24  ;;  %v920_v27 = vld [vmem:[%s1489_s7] ss:$0 sm:$0xff] }
  0xe3   :  { %v159_v34 = vmul.f32 %v155_v30, %v129_v23  ;;  %v153_v35 = vmul.f32 0.044715, %v139_v31  ;;  %v149_v61 = vmul.f32 0.5, %v139_v31 }
  0xe4   :  { %v158_v36 = vmul.f32 %v154_v33, %v144_v28  ;;  %v164_v37 = vadd.f32 %v160_v32, %v134_v21  ;;  %v925_v21 = vld [vmem:[%s1488_s6 + $0x20] sm:$0xff] }
  0xe5   :  { %v157_v38 = vmul.f32 %v153_v35, %v139_v31  ;;  %v163_v39 = vadd.f32 %v159_v34, %v129_v23  ;;  %v1126_v23 = vpack.c.bf16 %v926_v22, %v925_v21 }
  0xe6   :  { %v162_v40 = vmul.f32 %v158_v36, %v144_v28  ;;  %v168_v41 = vmul.f32 0.7978846, %v164_v37 }
  0xe7   :  { %v161_v42 = vmul.f32 %v157_v38, %v139_v31  ;;  %v167_v43 = vmul.f32 0.7978846, %v163_v39 }
  0xe8   :  { %1180 = vtanh.f32 %v168_v41  ;;  %v166_v44 = vadd.f32 %v162_v40, %v144_v28 }
  0xe9   :  { %1182 = vtanh.f32 %v167_v43  ;;  %v165_v45 = vadd.f32 %v161_v42, %v139_v31 }
  0xea   :  { %v170_v46 = vmul.f32 0.7978846, %v166_v44 }
  0xeb   :  { %v169_v47 = vmul.f32 0.7978846, %v165_v45 }
  0xec   :  { %1184 = vtanh.f32 %v170_v46 }
  0xed   :  { %1186 = vtanh.f32 %v169_v47 }
  0xf2   :  { %v1181_v48 = vpop.eup %1180 }
  0xf3   :  { %v1183_v49 = vpop.eup %1182  ;;  %v176_v51 = vadd.f32 1.0, %v1181_v48 }
  0xf4   :  { %v175_v53 = vadd.f32 1.0, %v1183_v49 }
  0xf5   :  { %v180_v54 = vmul.f32 %v176_v51, %v148_v50 }
  0xf6   :  { %v1185_v55 = vpop.eup %1184  ;;  %v179_v56 = vmul.f32 %v175_v53, %v147_v52 }
  0xf7   :  { %v1187_v57 = vpop.eup %1186  ;;  %v178_v59 = vadd.f32 1.0, %v1185_v55 }
  0xf8   :  { %v1110_v60 = vpack.c.bf16 %v180_v54, %v179_v56  ;;  %v177_v62 = vadd.f32 1.0, %v1187_v57 }
  0xf9   :  { %v182_v63 = vmul.f32 %v178_v59, %v150_v58 }
  0xfa   :  { %1111 = vmatprep.subr.bf16.mxu1 %v1110_v60  ;;  %v181_v2 = vmul.f32 %v177_v62, %v149_v61 }
  0xfb   :  { %1113 = vmatpush3.bf16.msra.mxu1 %v1110_v60 }
  0xfc   :  { %v1114_v4 = vpack.c.bf16 %v182_v63, %v181_v2 }
  0xfe   :  { %1115 = vmatprep.subr.bf16.mxu1 %v1114_v4 }
  0xff   :  { %1117 = vmatpush3.bf16.msra.mxu1 %v1114_v4 }
 0x100   :  { %1119 = vmatprep.subr.bf16.mxu1 %v1118_v5 }
 0x102   :  { %1016 = vmatmul.mubr.msk.f32.vlgmr.msra.gmra.mrb[4].mxu1 %vm213_vm1, %v913_v11 }
 0x103   :  { %1018 = vmatprep.mubr.msk.f32.mxu1 %vm213_vm1, %v914_v9  ;;  %1121 = vmatpush3.bf16.msra.mxu1 %v1118_v5  ;;  %v930_v9 = vld [vmem:[%s1489_s7 + $0x1] ss:$0 sm:$0xff] }
 0x104   :  { %1123 = vmatprep.subr.bf16.mxu1 %v1122_v10 }
 0x106   :  { %1019 = vmatmul.mubr.msk.f32.gmra.mrb[6].mxu1 %vm213_vm1, %v915_v13 }
 0x107   :  { %1125 = vmatpush3.bf16.msra.mxu1 %v1122_v10 }
 0x108   :  { %1127 = vmatprep.subr.bf16.mxu1 %v1126_v23 }
 0x1d5   :  { %v1017_v16 = vpop.f32.mrb[4].mxu1 }
 0x1d6   :  { %v292_v18 = vpop.f32.mrb[5].mxu1 }
 0x1d7   :  { %1029 = vmatprep.mubr.msk.f32.mxu1 %vm213_vm1, %v292_v18 }
 0x1d8   :  { %1030 = vmatmul.mubr.msk.f32.vlgmr.msra.gmra.mrb[8].mxu1 %vm213_vm1, %v1017_v16 }
 0x1d9   :  { %v1020_v19 = vpop.f32.mrb[6].mxu1  ;;  %1129 = vmatpush3.bf16.msra.mxu1 %v1126_v23 }
 0x1da   :  { %v302_v20 = vpop.f32.mrb[7].mxu1  ;;  %1131 = vmatprep.subr.bf16.mxu1 %v1130_v26 }
 0x1db   :  { %1032 = vmatprep.mubr.msk.f32.mxu1 %vm213_vm1, %v302_v20 }
 0x1dc   :  { %1033 = vmatmul.mubr.msk.f32.gmra.mrb[10].mxu1 %vm213_vm1, %v1020_v19 }
 0x1dd   :  { %1133 = vmatpush3.bf16.msra.mxu1 %v1130_v26 }
 0x1de   :  { %1140 = vmatprep.subr.bf16.mxu1 %v1234_v8 }
 0x2ab   :  { %v1031_v28 = vpop.f32.mrb[8].mxu1 }
 0x2ac   :  { %v406_v29 = vadd.f32 %v1031_v28, %v920_v27  ;;  %v400_v30 = vpop.f32.mrb[9].mxu1 }
 0x2ad   :  { %v401_v31 = vadd.f32 %v920_v27, %v400_v30 }
 0x2ae   :  { %v424_v32 = vmul.f32 0.044715, %v406_v29  ;;  %v420_v61 = vmul.f32 0.5, %v406_v29 }
 0x2af   :  { %v423_v33 = vmul.f32 0.044715, %v401_v31  ;;  %v1034_v34 = vpop.f32.mrb[10].mxu1  ;;  %v419_v59 = vmul.f32 0.5, %v401_v31 }
 0x2b0   :  { %v428_v35 = vmul.f32 %v424_v32, %v406_v29  ;;  %v416_v36 = vadd.f32 %v1034_v34, %v920_v27  ;;  %v410_v37 = vpop.f32.mrb[11].mxu1 }
 0x2b1   :  { %v427_v38 = vmul.f32 %v423_v33, %v401_v31  ;;  %v411_v39 = vadd.f32 %v920_v27, %v410_v37 }
 0x2b2   :  { %v432_v40 = vmul.f32 %v428_v35, %v406_v29  ;;  %v426_v41 = vmul.f32 0.044715, %v416_v36  ;;  %v422_v5 = vmul.f32 0.5, %v416_v36 }
 0x2b3   :  { %v431_v42 = vmul.f32 %v427_v38, %v401_v31  ;;  %v425_v43 = vmul.f32 0.044715, %v411_v39  ;;  %v421_v3 = vmul.f32 0.5, %v411_v39  ;;  %v602_v38 = vshrl.u32 %v187_v14, 7 }
 0x2b4   :  { %v436_v44 = vadd.f32 %v432_v40, %v406_v29  ;;  %v430_v45 = vmul.f32 %v426_v41, %v416_v36 }
 0x2b5   :  { %v435_v46 = vadd.f32 %v431_v42, %v401_v31  ;;  %v429_v47 = vmul.f32 %v425_v43, %v411_v39  ;;  %v603_v42 = vmul.u32 8, %v602_v38 }
 0x2b6   :  { %v440_v48 = vmul.f32 0.7978846, %v436_v44  ;;  %v434_v49 = vmul.f32 %v430_v45, %v416_v36 }
 0x2b7   :  { %v433_v50 = vmul.f32 %v429_v47, %v411_v39  ;;  %v439_v51 = vmul.f32 0.7978846, %v435_v46  ;;  %v604_v43 = vadd.s32 16, %v603_v42  ;;  %vm605_vm7 = vcmp.ge.s32.totalorder %v1336_v15, %v603_v42 }
 0x2b8   :  { %1188 = vtanh.f32 %v440_v48  ;;  %v438_v52 = vadd.f32 %v434_v49, %v416_v36  ;;  %v606_v48 = vadd.s32 8, %v603_v42 }
 0x2b9   :  { %v437_v53 = vadd.f32 %v433_v50, %v411_v39  ;;  %1190 = vtanh.f32 %v439_v51  ;;  %v612_v51 = vadd.s32 8, %v604_v43  ;;  %vm611_vm9 = vcmp.ge.s32.totalorder %v1336_v15, %v604_v43 }
 0x2ba   :  { %v442_v54 = vmul.f32 0.7978846, %v438_v52  ;;  %vm607_vm8 = vcmp.lt.s32.totalorder %v1336_v15, %v606_v48 }
 0x2bb   :  { %v441_v55 = vmul.f32 0.7978846, %v437_v53  ;;  %vm613_vm10 = vcmp.lt.s32.totalorder %v1336_v15, %v612_v51  ;;  %vm608_vm11 = vmand %vm605_vm7, %vm607_vm8  ;;  %v799_v15 = vld [vmem:[%s1490_s8] sm:$0xff] }
 0x2bc   :  { %1192 = vtanh.f32 %v442_v54  ;;  %vm614_vm12 = vmand %vm611_vm9, %vm613_vm10 }
 0x2bd   :  { %1194 = vtanh.f32 %v441_v55 }
 0x2c2   :  { %v1189_v56 = vpop.eup %1188 }
 0x2c3   :  { %v1191_v57 = vpop.eup %1190  ;;  %v448_v58 = vadd.f32 1.0, %v1189_v56 }
 0x2c4   :  { %v447_v60 = vadd.f32 1.0, %v1191_v57 }
 0x2c5   :  { %v452_v1 = vmul.f32 %v448_v58, %v420_v61 }
 0x2c6   :  { %v1193_v62 = vpop.eup %1192  ;;  %v451_v63 = vmul.f32 %v447_v60, %v419_v59 }
 0x2c7   :  { %v1195_v0 = vpop.eup %1194  ;;  %v450_v2 = vadd.f32 1.0, %v1193_v62 }
 0x2c8   :  { %1043 = vmatprep.mubr.msk.f32.mxu1 %vm213_vm1, %v451_v63  ;;  %v449_v4 = vadd.f32 1.0, %v1195_v0  ;;  %v935_v63 = vsel %vm608_vm11, 1.0, %v1233_v17  ;;  %v936_v0 = vsel %vm614_vm12, 1.0, %v1233_v17 }
 0x2c9   :  { %1044 = vmatmul.mubr.msk.f32.vlgmr.msra.gmra.mrb[12].mxu1 %vm213_vm1, %v452_v1  ;;  %v454_v7 = vmul.f32 %v450_v2, %v422_v5  ;;  %v800_v1 = vld [vmem:[%s1490_s8 + $0x8] sm:$0xff]  ;;  %v801_v2 = vld [vmem:[%s1490_s8 + $0x10] sm:$0xff] }
 0x2ca   :  { %v453_v6 = vmul.f32 %v449_v4, %v421_v3  ;;  %v1147_v3 = vpack.c.bf16 %v800_v1, %v799_v15  ;;  %v802_v4 = vld [vmem:[%s1490_s8 + $0x18] sm:$0xff] }
 0x2cb   :  { %v1150_v5 = vpack.c.bf16 %v802_v4, %v801_v2 }
 0x2cc   :  { %1046 = vmatprep.mubr.msk.f32.mxu1 %vm213_vm1, %v453_v6  ;;  %v804_v6 = vld [vmem:[%s1490_s8 + $0x28] sm:$0xff] }
 0x2cd   :  { %1047 = vmatmul.mubr.msk.f32.gmra.mrb[14].mxu1 %vm213_vm1, %v454_v7 }
 0x2ce   :  { %1068 = vmatprep.mubr.msk.f32.mxu1 %vm1235_vm6, %v1233_v17 }
 0x39c   :  { %v1045_v10 = vpop.f32.mrb[12].mxu1 }
 0x39d   :  { %v552_v11 = vadd.f32 %v1045_v10, %v930_v9  ;;  %v546_v12 = vpop.f32.mrb[13].mxu1  ;;  %v806_v10 = vld [vmem:[%s1490_s8 + $0x38] sm:$0xff] }
 0x39e   :  { %v547_v13 = vadd.f32 %v930_v9, %v546_v12  ;;  %v807_v12 = vld [vmem:[%s1490_s8 + $0x40] sm:$0xff] }
 0x39f   :  { %v570_v16 = vmul.f32 0.044715, %v552_v11  ;;  %v566_v46 = vmul.f32 0.5, %v552_v11 }
 0x3a0   :  { %v569_v18 = vmul.f32 0.044715, %v547_v13  ;;  %v1048_v19 = vpop.f32.mrb[14].mxu1  ;;  %v565_v49 = vmul.f32 0.5, %v547_v13 }
 0x3a1   :  { %v574_v20 = vmul.f32 %v570_v16, %v552_v11  ;;  %v562_v21 = vadd.f32 %v1048_v19, %v930_v9  ;;  %v556_v22 = vpop.f32.mrb[15].mxu1  ;;  %v810_v19 = vld [vmem:[%s1490_s8 + $0x58] sm:$0xff] }
 0x3a2   :  { %v573_v23 = vmul.f32 %v569_v18, %v547_v13  ;;  %v557_v24 = vadd.f32 %v930_v9, %v556_v22  ;;  %v805_v9 = vld [vmem:[%s1490_s8 + $0x30] sm:$0xff]  ;;  %v811_v22 = vld [vmem:[%s1490_s8 + $0x60] sm:$0xff] }
 0x3a3   :  { %v572_v25 = vmul.f32 0.044715, %v562_v21  ;;  %v578_v26 = vmul.f32 %v574_v20, %v552_v11  ;;  %v568_v55 = vmul.f32 0.5, %v562_v21  ;;  %v809_v18 = vld [vmem:[%s1490_s8 + $0x50] sm:$0xff] }
 0x3a4   :  { %v571_v27 = vmul.f32 0.044715, %v557_v24  ;;  %v577_v28 = vmul.f32 %v573_v23, %v547_v13  ;;  %v567_v58 = vmul.f32 0.5, %v557_v24  ;;  %v1162_v20 = vpack.c.bf16 %v810_v19, %v809_v18  ;;  %v812_v23 = vld [vmem:[%s1490_s8 + $0x68] sm:$0xff] }
 0x3a5   :  { %v576_v29 = vmul.f32 %v572_v25, %v562_v21  ;;  %v582_v30 = vadd.f32 %v578_v26, %v552_v11  ;;  %v1156_v11 = vpack.c.bf16 %v806_v10, %v805_v9  ;;  %v1165_v25 = vpack.c.bf16 %v812_v23, %v811_v22  ;;  %v813_v26 = vld [vmem:[%s1490_s8 + $0x70] sm:$0xff] }
 0x3a6   :  { %v575_v31 = vmul.f32 %v571_v27, %v557_v24  ;;  %v581_v32 = vadd.f32 %v577_v28, %v547_v13  ;;  %v808_v13 = vld [vmem:[%s1490_s8 + $0x48] sm:$0xff]  ;;  %v814_v27 = vld [vmem:[%s1490_s8 + $0x78] sm:$0xff] }
 0x3a7   :  { %v580_v33 = vmul.f32 %v576_v29, %v562_v21  ;;  %v586_v34 = vmul.f32 0.7978846, %v582_v30  ;;  %v1159_v16 = vpack.c.bf16 %v808_v13, %v807_v12  ;;  %v1168_v28 = vpack.c.bf16 %v814_v27, %v813_v26 }
 0x3a8   :  { %v579_v35 = vmul.f32 %v575_v31, %v557_v24  ;;  %v585_v36 = vmul.f32 0.7978846, %v581_v32 }
 0x3a9   :  { %1196 = vtanh.f32 %v586_v34  ;;  %v584_v37 = vadd.f32 %v580_v33, %v562_v21  ;;  %v694_v21 = vpop.permute.xlu0 %693 }
 0x3aa   :  { %1198 = vtanh.f32 %v585_v36  ;;  %v583_v39 = vadd.f32 %v579_v35, %v557_v24  ;;  %v775_v24 = vpop.permute.xlu1 %774 }
 0x3ab   :  { %v588_v40 = vmul.f32 0.7978846, %v584_v37 }
 0x3ac   :  { %v587_v41 = vmul.f32 0.7978846, %v583_v39 }
 0x3ad   :  { %1200 = vtanh.f32 %v588_v40 }
 0x3ae   :  { %1202 = vtanh.f32 %v587_v41 }
 0x3af   :  { %1204 = vrcp.f32 %v694_v21 }
 0x3b0   :  { %1206 = vrcp.f32 %v775_v24 }
 0x3b3   :  { %v1197_v44 = vpop.eup %1196 }
 0x3b4   :  { %v1199_v45 = vpop.eup %1198  ;;  %v594_v47 = vadd.f32 1.0, %v1197_v44 }
 0x3b5   :  { %v593_v50 = vadd.f32 1.0, %v1199_v45  ;;  %v939_v45 = vld [vmem:[%s1491_s9] ss:$0 sm:$0xff] }
 0x3b6   :  { %v598_v52 = vmul.f32 %v594_v47, %v566_v46 }
 0x3b7   :  { %v1201_v53 = vpop.eup %1200  ;;  %v597_v54 = vmul.f32 %v593_v50, %v565_v49 }
 0x3b8   :  { %v1203_v14 = vpop.eup %1202  ;;  %v596_v56 = vadd.f32 1.0, %v1201_v53 }
 0x3b9   :  { %v1135_v57 = vpack.c.bf16 %v598_v52, %v597_v54  ;;  %v595_v59 = vadd.f32 1.0, %v1203_v14  ;;  %v1205_v29 = vpop.eup %1204 }
 0x3ba   :  { %v600_v60 = vmul.f32 %v596_v56, %v568_v55  ;;  %v1207_v30 = vpop.eup %1206 }
 0x3bb   :  { %1136 = vmatpush3.bf16.msra.mxu0 %v1135_v57  ;;  %1142 = vmatpush3.bf16.msra.mxu1 %v1135_v57  ;;  %v599_v61 = vmul.f32 %v595_v59, %v567_v58 }
 0x3bc   :  { %1137 = vmatprep.subr.bf16.mxu0 %v1234_v8  ;;  %1143 = vmatprep.subr.bf16.mxu1 %v1234_v8 }
 0x3bd   :  { %v1138_v62 = vpack.c.bf16 %v600_v60, %v599_v61 }
 0x3bf   :  { %1139 = vmatpush3.bf16.msra.mxu0 %v1138_v62  ;;  %1145 = vmatpush3.bf16.msra.mxu1 %v1138_v62 }
 0x3c0   :  { %1146 = vmatprep.subr.bf16.mxu0 %v1234_v8 }
 0x3c2   :  { %1058 = vmatmul.mubr.msk.f32.vlgmr.msra.gmra.mrb[0].mxu0 %vm213_vm1, %v935_v63  ;;  %1069 = vmatmul.mubr.msk.f32.vlgmr.msra.gmra.mrb[16].mxu1 %vm213_vm1, %v936_v0 }
 0x3c3   :  { %1103 = vmatprep.mubr.msk.f32.mxu0 %vm1235_vm6, %v1233_v17  ;;  %1148 = vmatpush3.bf16.msra.mxu0 %v1147_v3  ;;  %v803_v17 = vld [vmem:[%s1490_s8 + $0x20] sm:$0xff] }
 0x3c4   :  { %1149 = vmatprep.subr.bf16.mxu0 %v1234_v8  ;;  %v1153_v7 = vpack.c.bf16 %v804_v6, %v803_v17 }
 0x3c7   :  { %1151 = vmatpush3.bf16.msra.mxu0 %v1150_v5 }
 0x3c8   :  { %1152 = vmatprep.subr.bf16.mxu0 %v1234_v8 }
 0x3cb   :  { %1154 = vmatpush3.bf16.msra.mxu0 %v1153_v7 }
 0x3cc   :  { %1155 = vmatprep.subr.bf16.mxu0 %v1234_v8 }
 0x3cf   :  { %1157 = vmatpush3.bf16.msra.mxu0 %v1156_v11 }
 0x3d0   :  { %1158 = vmatprep.subr.bf16.mxu0 %v1234_v8 }
 0x3d3   :  { %1160 = vmatpush3.bf16.msra.mxu0 %v1159_v16 }
 0x3d4   :  { %1161 = vmatprep.subr.bf16.mxu0 %v1234_v8 }
 0x3d7   :  { %1163 = vmatpush3.bf16.msra.mxu0 %v1162_v20 }
 0x3d8   :  { %1164 = vmatprep.subr.bf16.mxu0 %v1234_v8 }
 0x3db   :  { %1166 = vmatpush3.bf16.msra.mxu0 %v1165_v25 }
 0x3dc   :  { %1167 = vmatprep.subr.bf16.mxu0 %v1234_v8 }
 0x3df   :  { %1169 = vmatpush3.bf16.msra.mxu0 %v1168_v28 }
 0x495   :  { %v686_v31 = vpop.f32.mrb[0].mxu0  ;;  %v767_v32 = vpop.f32.mrb[16].mxu1 }
 0x496   :  { %v697_v33 = vmul.f32 %v1205_v29, %v686_v31  ;;  %v778_v34 = vmul.f32 %v1207_v30, %v767_v32  ;;  %v1059_v35 = vpop.f32.mrb[1].mxu0  ;;  %v1070_v36 = vpop.f32.mrb[17].mxu1 }
 0x498   :  { %783 = vrot.lane.b32.xlu0 %v778_v34, %s1236_s14  ;;  %v779_v8 = vsub.f32 %v697_v33, %v778_v34  ;;  %v781_v37 = vmul.f32 %v778_v34, %v697_v33 }
 0x49a   :  { %v780_v38 = vand.u32 2147483647, %v779_v8 }
 0x49c   :  { %791 = vrot.lane.b32.xlu0 %v781_v37, %s1237_s15  ;;  %787 = vrot.lane.b32.xlu1 %v780_v38, %s1238_s0 }
 0x50a   :  { %v784_v39 = vpop.permute.xlu0 %783 }
 0x50b   :  { %v794_v40 = vsel %vm213_vm1, %v697_v33, %v784_v39 }
 0x50e   :  { %v792_v41 = vpop.permute.xlu0 %791  ;;  %v788_v42 = vpop.permute.xlu1 %787 }
 0x50f   :  { %v796_v43 = vsel %vm795_vm13, %v794_v40, %v788_v42 }
 0x510   :  { %v798_v44 = vsel %vm797_vm14, %v796_v43, %v792_v41 }
 0x511   :  { %1104 = vmatmul.mubr.f32.vlgmr.msra.gmra.mrb[2].mxu0 %v798_v44 }
 0x5e4   :  { %v888_v46 = vpop.f32.mrb[2].mxu0 }
 0x5e5   :  { %v889_v47 = vadd.f32 %v939_v45, %v888_v46  ;;  %v1105_v48 = vpop.f32.mrb[3].mxu0 }
 0x5e7   :  { %892 = vst [vmem:[#allocation2] sm:$0x3] %v889_v47 }
 0x5e8   :  { %1219 = shalt.err (!%p1216_p4)
}
 0x5e9   :  { %s1220_s18 = scalar_lea.hbm %s1492_s10, 32 }
 0x5ea   :  { %p1221_p5 = scmp.ne.s32.totalorder %s1492_s10, %s1220_s18  ;;  %p1224_p6 = scmp.lt.u32.totalorder %s1220_s18, %s1492_s10 }
 0x5ec   :  { %p1226_p7 = pnand %p1224_p6, %p1221_p5 }
 0x5ee   :  { %1229 = shalt.err (!%p1226_p7)
}
 0x5ef   :  { %902 = dma.vmem_to_hbm [thread:$0]  %s900_s3, 32, %s1492_s10, [#allocation3]  }
 0x5f0   :  { %1230 = dma.done.wait [#allocation3], 32  }
 0x5f1   :  { %1231 = vsyncadd [#allocation3], 4294967264 }
 0x5f2   :  { %906 = vsyncpa [#allocation3], 1 }

</bundles_post_ra>
